<compile_context>
chip_gen: v5e
topology: v5e:2x2
jax: 0.10.0
libtpu: 0.0.40
codegen_flags: <defaults>
</compile_context>

<pallas_src>
import functools
import math

import jax
import jax.numpy as jnp
from jax.experimental import pallas as pl
from jax.experimental.pallas import tpu as pltpu

_EPS = 0.1          # label-smoothing eps (module default)
_LAM = 0.25         # SuperLoss lam (module default)
_LW_ITERS = 3       # Halley iterations for Lambert W0 (cubic convergence)


def _lambertw0(y):
    """Principal-branch Lambert W for real y >= -1/e, elementwise (VPU/EUP)."""
    e = jnp.float32(math.e)
    # Region-specific seeds.
    # (a) near the branch point y ~ -1/e: series in p = sqrt(2*(e*y + 1))
    p = jnp.sqrt(jnp.maximum(2.0 * (e * y + 1.0), 0.0))
    w_branch = -1.0 + p - (p * p) * jnp.float32(1.0 / 3.0) + jnp.float32(11.0 / 72.0) * p * p * p
    # (b) moderate y
    w_mid = jnp.log1p(jnp.maximum(y, -0.999))
    # (c) large y: asymptotic log(y) - log(log(y))
    ly = jnp.log(jnp.maximum(y, 1.2))
    w_big = ly - jnp.log(ly)
    w = jnp.where(y < -0.2, w_branch, jnp.where(y < 2.0, w_mid, w_big))

    # Halley iterations: f(w) = w*e^w - y ; divides -> EUP approx reciprocal.
    for _ in range(_LW_ITERS):
        ew = jnp.exp(w)
        f = w * ew - y
        wp1 = w + 1.0
        denom = ew * wp1 - (w + 2.0) * f * pl.reciprocal(2.0 * wp1 + 1e-20, approx=True)
        denom = jnp.where(jnp.abs(denom) < 1e-20, 1e-20, denom)  # branch-point safety
        w = w - f * pl.reciprocal(denom, approx=True)
    return w


def _loss_kernel(logits_ref, target_ref, out_ref, *, total_rows):
    """One batch tile -> (8,128) slab with partial sums at [0,0] (loss_ls) and [0,1] (SuperLoss)."""
    x = logits_ref[...].astype(jnp.float32)          # (TB, C), cast-on-load in VMEM
    t = target_ref[...]                              # (TB, 1) int32
    TB, C = x.shape
    tile = pl.program_id(0)

    # Mask padded rows (only generated when B % TB != 0 — static decision).
    need_mask = (total_rows % TB) != 0
    if need_mask:
        row = jax.lax.broadcasted_iota(jnp.int32, (TB, 1), 0) + tile * TB
        valid = row < total_rows                     # (TB, 1) bool
        x = jnp.where(valid, x, 0.0)                 # sanitize garbage rows
        t = jnp.where(valid, t, 0)

    # Fused log-softmax statistics (log_preds never materialized).
    m = jnp.max(x, axis=-1, keepdims=True)                           # (TB,1)
    s = m + jnp.log(jnp.sum(jnp.exp(x - m), axis=-1, keepdims=True)) # logsumexp
    rowsum = jnp.sum(x, axis=-1, keepdims=True)                      # (TB,1)

    # -sum_C log_preds  ==  C*s - rowsum(x)
    loss_ls_row = jnp.float32(C) * s - rowsum                        # (TB,1)

    # nll_i = s - x[i, target_i]  via one-hot select
    col = jax.lax.broadcasted_iota(jnp.int32, (TB, C), 1)
    xt = jnp.sum(jnp.where(col == t, x, 0.0), axis=-1, keepdims=True)
    nll = s - xt                                                     # (TB,1)

    # SuperLoss per row:  (nll - tau)*sigma + lam*w^2   with sigma = exp(-w)
    tau = jnp.float32(math.log(C))
    d = nll - tau
    y = 0.5 * jnp.maximum(jnp.float32(-2.0 / math.e), d * jnp.float32(1.0 / _LAM))
    w = _lambertw0(y)
    sigma = jnp.exp(-w)
    sl_row = d * sigma + jnp.float32(_LAM) * w * w                   # log(sigma)^2 == w^2 exactly

    if need_mask:
        validf = valid.astype(jnp.float32)
        loss_ls_row = loss_ls_row * validf
        sl_row = sl_row * validf

    ls_part = jnp.sum(loss_ls_row)
    sl_part = jnp.sum(sl_row)

    # Lane-dense, unmasked (8,128) store: lane 0 = loss_ls partial, lane 1 = SuperLoss partial.
    r_iota = jax.lax.broadcasted_iota(jnp.int32, (8, 128), 0)
    l_iota = jax.lax.broadcasted_iota(jnp.int32, (8, 128), 1)
    out_ref[...] = jnp.where((r_iota == 0) & (l_iota == 0), ls_part,
                             jnp.where((r_iota == 0) & (l_iota == 1), sl_part,
                                       jnp.float32(0.0)))


def label_smoothing_ce_superloss(logits, target, *, eps=_EPS, tb=None):
    """logits: (B, C) float (any dtype, bf16 preferred); target: (B,) int. Returns scalar f32 loss."""
    B, C = logits.shape
    itemsize = jnp.dtype(logits.dtype).itemsize

    if tb is None:
        # Size the batch tile so 2 double-buffered logits tiles stay well under the
        # scoped-VMEM default on every generation (v5e 16 MiB, v6e/v7x 32 MiB,
        # v7x has only 64 MiB physical VMEM) -> ~8 MiB budget for the logits buffers.
        budget = 8 << 20
        tb = budget // (2 * C * itemsize)
        tb = max(8, min(512, (tb // 8) * 8))
    tb = min(tb, ((B + 7) // 8) * 8)      # never exceed the (padded) batch
    tb = max(8, (tb // 8) * 8)
    num_tiles = pl.cdiv(B, tb)

    target2d = target.reshape(B, 1).astype(jnp.int32)
    kernel = functools.partial(_loss_kernel, total_rows=B)

    partials = pl.pallas_call(
        kernel,
        out_shape=jax.ShapeDtypeStruct((num_tiles * 8, 128), jnp.float32),
        grid=(num_tiles,),
        in_specs=[
            pl.BlockSpec((tb, C), lambda i: (i, 0)),   # logits tile (native dtype over the wire)
            pl.BlockSpec((tb, 1), lambda i: (i, 0)),   # targets tile
        ],
        out_specs=pl.BlockSpec((8, 128), lambda i: (i, 0)),
        compiler_params=pltpu.CompilerParams(
            # No cross-iteration accumulator -> batch axis is truly parallel
            # (shards across both TensorCores on v7x).
            dimension_semantics=("parallel",)),
    )(logits, target2d)

    # Tiny final combine in plain JAX.
    sums = jnp.sum(partials, axis=0)                   # (128,)
    loss_ls = sums[0] / B
    sl = sums[1] / B
    return loss_ls * eps / C + (1.0 - eps) * sl


if __name__ == "__main__":
    B, C = 16, 128   # small, lane-aligned classification problem
    key = jax.random.PRNGKey(0)
    k1, k2 = jax.random.split(key)
    logits = jax.random.normal(k1, (B, C), dtype=jnp.float32)   # pass native dtype (no wrapper cast)
    target = jax.random.randint(k2, (B,), 0, C, dtype=jnp.int32)

    # tb=8 -> 2 grid tiles, exercises the parallel batch tiling + JAX-side combine.
    loss = label_smoothing_ce_superloss(logits, target, tb=8)
    loss = jax.block_until_ready(loss)
    assert bool(jnp.isfinite(loss)), "loss is not finite"
    print("KERNEL_OK")
</pallas_src>

<mosaic_0001>
module attributes {stable_mosaic.version = 11 : i64} {
  func.func @_loss_kernel(%arg0: i32, %arg1: memref<8x128xf32, #tpu.memory_space<vmem>>, %arg2: memref<8x1xi32, #tpu.memory_space<vmem>>, %arg3: memref<8x128xf32, #tpu.memory_space<vmem>>) attributes {dimension_semantics = [#tpu.dimension_semantics<parallel>], iteration_bounds = array<i64: 2>, scalar_prefetch = 0 : i64, scratch_operands = 0 : i64, tpu.core_type = #tpu.core_type<tc>, window_params = [{transform_indices = @transform_0, window_bounds = array<i64: 8, 128>}, {transform_indices = @transform_1, window_bounds = array<i64: 8, 1>}, {transform_indices = @transform_2, window_bounds = array<i64: 8, 128>}]} {
    %c0 = arith.constant 0 : index
    %c0_0 = arith.constant 0 : index
    %0 = vector.load %arg1[%c0, %c0_0] : memref<8x128xf32, #tpu.memory_space<vmem>>, vector<8x128xf32>
    %c0_1 = arith.constant 0 : index
    %c0_2 = arith.constant 0 : index
    %1 = vector.load %arg2[%c0_1, %c0_2] : memref<8x1xi32, #tpu.memory_space<vmem>>, vector<8x1xi32>
    %cst = arith.constant dense<0xFF800000> : vector<8xf32>
    %2 = vector.multi_reduction <maximumf>, %0, %cst [1] : vector<8x128xf32> to vector<8xf32>
    %3 = vector.shape_cast %2 : vector<8xf32> to vector<8x1xf32>
    %4 = vector.broadcast %3 : vector<8x1xf32> to vector<8x128xf32>
    %5 = arith.subf %0, %4 : vector<8x128xf32>
    %6 = math.exp %5 : vector<8x128xf32>
    %cst_3 = arith.constant dense<0.000000e+00> : vector<8xf32>
    %7 = vector.multi_reduction <add>, %6, %cst_3 [1] : vector<8x128xf32> to vector<8xf32>
    %8 = vector.shape_cast %7 : vector<8xf32> to vector<8x1xf32>
    %9 = math.log %8 : vector<8x1xf32>
    %10 = arith.addf %3, %9 : vector<8x1xf32>
    %cst_4 = arith.constant dense<0.000000e+00> : vector<8xf32>
    %11 = vector.multi_reduction <add>, %0, %cst_4 [1] : vector<8x128xf32> to vector<8xf32>
    %12 = vector.shape_cast %11 : vector<8xf32> to vector<8x1xf32>
    %cst_5 = arith.constant 1.280000e+02 : f32
    %13 = vector.broadcast %cst_5 : f32 to vector<8x1xf32>
    %14 = arith.mulf %13, %10 : vector<8x1xf32>
    %15 = arith.subf %14, %12 : vector<8x1xf32>
    %16 = tpu.iota {dimensions = array<i32: 1>} : vector<8x128xi32>
    %17 = vector.broadcast %1 : vector<8x1xi32> to vector<8x128xi32>
    %18 = arith.cmpi eq, %16, %17 : vector<8x128xi32>
    %cst_6 = arith.constant 0.000000e+00 : f32
    %19 = vector.broadcast %cst_6 : f32 to vector<8x128xf32>
    %20 = arith.select %18, %0, %19 : vector<8x128xi1>, vector<8x128xf32>
    %cst_7 = arith.constant dense<0.000000e+00> : vector<8xf32>
    %21 = vector.multi_reduction <add>, %20, %cst_7 [1] : vector<8x128xf32> to vector<8xf32>
    %22 = vector.shape_cast %21 : vector<8xf32> to vector<8x1xf32>
    %23 = arith.subf %10, %22 : vector<8x1xf32>
    %cst_8 = arith.constant 4.85203028 : f32
    %24 = vector.broadcast %cst_8 : f32 to vector<8x1xf32>
    %25 = arith.subf %23, %24 : vector<8x1xf32>
    %cst_9 = arith.constant 4.000000e+00 : f32
    %26 = vector.broadcast %cst_9 : f32 to vector<8x1xf32>
    %27 = arith.mulf %25, %26 : vector<8x1xf32>
    %cst_10 = arith.constant -0.735758901 : f32
    %28 = vector.broadcast %cst_10 : f32 to vector<8x1xf32>
    %29 = arith.maximumf %28, %27 : vector<8x1xf32>
    %cst_11 = arith.constant 5.000000e-01 : f32
    %30 = vector.broadcast %cst_11 : f32 to vector<8x1xf32>
    %31 = arith.mulf %30, %29 : vector<8x1xf32>
    %cst_12 = arith.constant 2.71828175 : f32
    %32 = vector.broadcast %cst_12 : f32 to vector<8x1xf32>
    %33 = arith.mulf %32, %31 : vector<8x1xf32>
    %cst_13 = arith.constant 1.000000e+00 : f32
    %34 = vector.broadcast %cst_13 : f32 to vector<8x1xf32>
    %35 = arith.addf %33, %34 : vector<8x1xf32>
    %cst_14 = arith.constant 2.000000e+00 : f32
    %36 = vector.broadcast %cst_14 : f32 to vector<8x1xf32>
    %37 = arith.mulf %36, %35 : vector<8x1xf32>
    %cst_15 = arith.constant 0.000000e+00 : f32
    %38 = vector.broadcast %cst_15 : f32 to vector<8x1xf32>
    %39 = arith.maximumf %37, %38 : vector<8x1xf32>
    %40 = math.sqrt %39 : vector<8x1xf32>
    %cst_16 = arith.constant -1.000000e+00 : f32
    %41 = vector.broadcast %cst_16 : f32 to vector<8x1xf32>
    %42 = arith.addf %41, %40 : vector<8x1xf32>
    %43 = arith.mulf %40, %40 : vector<8x1xf32>
    %cst_17 = arith.constant 0.333333343 : f32
    %44 = vector.broadcast %cst_17 : f32 to vector<8x1xf32>
    %45 = arith.mulf %43, %44 : vector<8x1xf32>
    %46 = arith.subf %42, %45 : vector<8x1xf32>
    %cst_18 = arith.constant 0.152777776 : f32
    %47 = vector.broadcast %cst_18 : f32 to vector<8x1xf32>
    %48 = arith.mulf %47, %40 : vector<8x1xf32>
    %49 = arith.mulf %48, %40 : vector<8x1xf32>
    %50 = arith.mulf %49, %40 : vector<8x1xf32>
    %51 = arith.addf %46, %50 : vector<8x1xf32>
    %cst_19 = arith.constant -9.990000e-01 : f32
    %52 = vector.broadcast %cst_19 : f32 to vector<8x1xf32>
    %53 = arith.maximumf %31, %52 : vector<8x1xf32>
    %54 = math.log1p %53 : vector<8x1xf32>
    %cst_20 = arith.constant 1.200000e+00 : f32
    %55 = vector.broadcast %cst_20 : f32 to vector<8x1xf32>
    %56 = arith.maximumf %31, %55 : vector<8x1xf32>
    %57 = math.log %56 : vector<8x1xf32>
    %58 = math.log %57 : vector<8x1xf32>
    %59 = arith.subf %57, %58 : vector<8x1xf32>
    %cst_21 = arith.constant -2.000000e-01 : f32
    %60 = vector.broadcast %cst_21 : f32 to vector<8x1xf32>
    %61 = arith.cmpf olt, %31, %60 : vector<8x1xf32>
    %cst_22 = arith.constant 2.000000e+00 : f32
    %62 = vector.broadcast %cst_22 : f32 to vector<8x1xf32>
    %63 = arith.cmpf olt, %31, %62 : vector<8x1xf32>
    %64 = arith.select %63, %54, %59 : vector<8x1xi1>, vector<8x1xf32>
    %65 = arith.select %61, %51, %64 : vector<8x1xi1>, vector<8x1xf32>
    %66 = math.exp %65 : vector<8x1xf32>
    %67 = arith.mulf %65, %66 : vector<8x1xf32>
    %68 = arith.subf %67, %31 : vector<8x1xf32>
    %cst_23 = arith.constant 1.000000e+00 : f32
    %69 = vector.broadcast %cst_23 : f32 to vector<8x1xf32>
    %70 = arith.addf %65, %69 : vector<8x1xf32>
    %71 = arith.mulf %66, %70 : vector<8x1xf32>
    %cst_24 = arith.constant 2.000000e+00 : f32
    %72 = vector.broadcast %cst_24 : f32 to vector<8x1xf32>
    %73 = arith.addf %65, %72 : vector<8x1xf32>
    %74 = arith.mulf %73, %68 : vector<8x1xf32>
    %cst_25 = arith.constant 2.000000e+00 : f32
    %75 = vector.broadcast %cst_25 : f32 to vector<8x1xf32>
    %76 = arith.mulf %75, %70 : vector<8x1xf32>
    %cst_26 = arith.constant 9.99999968E-21 : f32
    %77 = vector.broadcast %cst_26 : f32 to vector<8x1xf32>
    %78 = arith.addf %76, %77 : vector<8x1xf32>
    %79 = tpu.reciprocal %78 {approx = true} : vector<8x1xf32> -> vector<8x1xf32>
    %80 = arith.mulf %74, %79 : vector<8x1xf32>
    %81 = arith.subf %71, %80 : vector<8x1xf32>
    %82 = math.absf %81 : vector<8x1xf32>
    %cst_27 = arith.constant 9.99999968E-21 : f32
    %83 = vector.broadcast %cst_27 : f32 to vector<8x1xf32>
    %84 = arith.cmpf olt, %82, %83 : vector<8x1xf32>
    %cst_28 = arith.constant 9.99999968E-21 : f32
    %85 = vector.broadcast %cst_28 : f32 to vector<8x1xf32>
    %86 = arith.select %84, %85, %81 : vector<8x1xi1>, vector<8x1xf32>
    %87 = tpu.reciprocal %86 {approx = true} : vector<8x1xf32> -> vector<8x1xf32>
    %88 = arith.mulf %68, %87 : vector<8x1xf32>
    %89 = arith.subf %65, %88 : vector<8x1xf32>
    %90 = math.exp %89 : vector<8x1xf32>
    %91 = arith.mulf %89, %90 : vector<8x1xf32>
    %92 = arith.subf %91, %31 : vector<8x1xf32>
    %cst_29 = arith.constant 1.000000e+00 : f32
    %93 = vector.broadcast %cst_29 : f32 to vector<8x1xf32>
    %94 = arith.addf %89, %93 : vector<8x1xf32>
    %95 = arith.mulf %90, %94 : vector<8x1xf32>
    %cst_30 = arith.constant 2.000000e+00 : f32
    %96 = vector.broadcast %cst_30 : f32 to vector<8x1xf32>
    %97 = arith.addf %89, %96 : vector<8x1xf32>
    %98 = arith.mulf %97, %92 : vector<8x1xf32>
    %cst_31 = arith.constant 2.000000e+00 : f32
    %99 = vector.broadcast %cst_31 : f32 to vector<8x1xf32>
    %100 = arith.mulf %99, %94 : vector<8x1xf32>
    %cst_32 = arith.constant 9.99999968E-21 : f32
    %101 = vector.broadcast %cst_32 : f32 to vector<8x1xf32>
    %102 = arith.addf %100, %101 : vector<8x1xf32>
    %103 = tpu.reciprocal %102 {approx = true} : vector<8x1xf32> -> vector<8x1xf32>
    %104 = arith.mulf %98, %103 : vector<8x1xf32>
    %105 = arith.subf %95, %104 : vector<8x1xf32>
    %106 = math.absf %105 : vector<8x1xf32>
    %cst_33 = arith.constant 9.99999968E-21 : f32
    %107 = vector.broadcast %cst_33 : f32 to vector<8x1xf32>
    %108 = arith.cmpf olt, %106, %107 : vector<8x1xf32>
    %cst_34 = arith.constant 9.99999968E-21 : f32
    %109 = vector.broadcast %cst_34 : f32 to vector<8x1xf32>
    %110 = arith.select %108, %109, %105 : vector<8x1xi1>, vector<8x1xf32>
    %111 = tpu.reciprocal %110 {approx = true} : vector<8x1xf32> -> vector<8x1xf32>
    %112 = arith.mulf %92, %111 : vector<8x1xf32>
    %113 = arith.subf %89, %112 : vector<8x1xf32>
    %114 = math.exp %113 : vector<8x1xf32>
    %115 = arith.mulf %113, %114 : vector<8x1xf32>
    %116 = arith.subf %115, %31 : vector<8x1xf32>
    %cst_35 = arith.constant 1.000000e+00 : f32
    %117 = vector.broadcast %cst_35 : f32 to vector<8x1xf32>
    %118 = arith.addf %113, %117 : vector<8x1xf32>
    %119 = arith.mulf %114, %118 : vector<8x1xf32>
    %cst_36 = arith.constant 2.000000e+00 : f32
    %120 = vector.broadcast %cst_36 : f32 to vector<8x1xf32>
    %121 = arith.addf %113, %120 : vector<8x1xf32>
    %122 = arith.mulf %121, %116 : vector<8x1xf32>
    %cst_37 = arith.constant 2.000000e+00 : f32
    %123 = vector.broadcast %cst_37 : f32 to vector<8x1xf32>
    %124 = arith.mulf %123, %118 : vector<8x1xf32>
    %cst_38 = arith.constant 9.99999968E-21 : f32
    %125 = vector.broadcast %cst_38 : f32 to vector<8x1xf32>
    %126 = arith.addf %124, %125 : vector<8x1xf32>
    %127 = tpu.reciprocal %126 {approx = true} : vector<8x1xf32> -> vector<8x1xf32>
    %128 = arith.mulf %122, %127 : vector<8x1xf32>
    %129 = arith.subf %119, %128 : vector<8x1xf32>
    %130 = math.absf %129 : vector<8x1xf32>
    %cst_39 = arith.constant 9.99999968E-21 : f32
    %131 = vector.broadcast %cst_39 : f32 to vector<8x1xf32>
    %132 = arith.cmpf olt, %130, %131 : vector<8x1xf32>
    %cst_40 = arith.constant 9.99999968E-21 : f32
    %133 = vector.broadcast %cst_40 : f32 to vector<8x1xf32>
    %134 = arith.select %132, %133, %129 : vector<8x1xi1>, vector<8x1xf32>
    %135 = tpu.reciprocal %134 {approx = true} : vector<8x1xf32> -> vector<8x1xf32>
    %136 = arith.mulf %116, %135 : vector<8x1xf32>
    %137 = arith.subf %113, %136 : vector<8x1xf32>
    %cst_41 = arith.constant 0.000000e+00 : f32
    %138 = vector.broadcast %cst_41 : f32 to vector<8x1xf32>
    %139 = arith.subf %138, %137 : vector<8x1xf32>
    %140 = math.exp %139 : vector<8x1xf32>
    %141 = arith.mulf %25, %140 : vector<8x1xf32>
    %cst_42 = arith.constant 2.500000e-01 : f32
    %142 = vector.broadcast %cst_42 : f32 to vector<8x1xf32>
    %143 = arith.mulf %142, %137 : vector<8x1xf32>
    %144 = arith.mulf %143, %137 : vector<8x1xf32>
    %145 = arith.addf %141, %144 : vector<8x1xf32>
    %146 = vector.shape_cast %15 : vector<8x1xf32> to vector<1x8x1xf32>
    %cst_43 = arith.constant dense<0.000000e+00> : vector<1xf32>
    %147 = vector.multi_reduction <add>, %146, %cst_43 [1, 2] : vector<1x8x1xf32> to vector<1xf32>
    %148 = vector.shape_cast %147 : vector<1xf32> to vector<1x1x1xf32>
    %149 = vector.extract %148[0, 0, 0] : f32 from vector<1x1x1xf32>
    %150 = vector.shape_cast %145 : vector<8x1xf32> to vector<1x8x1xf32>
    %cst_44 = arith.constant dense<0.000000e+00> : vector<1xf32>
    %151 = vector.multi_reduction <add>, %150, %cst_44 [1, 2] : vector<1x8x1xf32> to vector<1xf32>
    %152 = vector.shape_cast %151 : vector<1xf32> to vector<1x1x1xf32>
    %153 = vector.extract %152[0, 0, 0] : f32 from vector<1x1x1xf32>
    %154 = tpu.iota {dimensions = array<i32: 0>} : vector<8x128xi32>
    %155 = tpu.iota {dimensions = array<i32: 1>} : vector<8x128xi32>
    %c0_i32 = arith.constant 0 : i32
    %156 = vector.broadcast %c0_i32 : i32 to vector<8x128xi32>
    %157 = arith.cmpi eq, %154, %156 : vector<8x128xi32>
    %c0_i32_45 = arith.constant 0 : i32
    %158 = vector.broadcast %c0_i32_45 : i32 to vector<8x128xi32>
    %159 = arith.cmpi eq, %155, %158 : vector<8x128xi32>
    %160 = arith.andi %157, %159 : vector<8x128xi1>
    %c0_i32_46 = arith.constant 0 : i32
    %161 = vector.broadcast %c0_i32_46 : i32 to vector<8x128xi32>
    %162 = arith.cmpi eq, %154, %161 : vector<8x128xi32>
    %c1_i32 = arith.constant 1 : i32
    %163 = vector.broadcast %c1_i32 : i32 to vector<8x128xi32>
    %164 = arith.cmpi eq, %155, %163 : vector<8x128xi32>
    %165 = arith.andi %162, %164 : vector<8x128xi1>
    %cst_47 = arith.constant 0.000000e+00 : f32
    %166 = vector.broadcast %153 : f32 to vector<8x128xf32>
    %167 = vector.broadcast %cst_47 : f32 to vector<8x128xf32>
    %168 = arith.select %165, %166, %167 : vector<8x128xi1>, vector<8x128xf32>
    %169 = vector.broadcast %149 : f32 to vector<8x128xf32>
    %170 = arith.select %160, %169, %168 : vector<8x128xi1>, vector<8x128xf32>
    %c0_48 = arith.constant 0 : index
    %c0_49 = arith.constant 0 : index
    %171 = vector.load %arg3[%c0_48, %c0_49] : memref<8x128xf32, #tpu.memory_space<vmem>>, vector<8x128xf32>
    tpu.vector_store %arg3[%c0_48, %c0_49], %170 {strides = array<i32>} : memref<8x128xf32, #tpu.memory_space<vmem>>, vector<8x128xf32>,
    return
  }
  func.func @transform_0(%arg0: i32) -> (i32, i32) {
    %c0_i32 = arith.constant 0 : i32
    %c0_i32_0 = arith.constant 0 : i32
    return %arg0, %c0_i32 : i32, i32
  }
  func.func @transform_1(%arg0: i32) -> (i32, i32) {
    %c0_i32 = arith.constant 0 : i32
    %c0_i32_0 = arith.constant 0 : i32
    return %arg0, %c0_i32 : i32, i32
  }
  func.func @transform_2(%arg0: i32) -> (i32, i32) {
    %c0_i32 = arith.constant 0 : i32
    %c0_i32_0 = arith.constant 0 : i32
    return %arg0, %c0_i32 : i32, i32
  }
}

</mosaic_0001>

<bundles_post_ra>
// kernel: tpu_custom_call.1
= control target key start
LH: loop header
LB: loop body
LE: loop exit
PB: predicated region body
PF: predicated region fallthrough
CT: control target
= control target key end

     0   :  { %7 = vsyncpa [#allocation3], 0  ;;  %s694_s0 = inlined_call_operand.vmem [shape: f32[16,128], index: 0, kind: input, shape index: {}]   ;;  %s695_s1 = inlined_call_operand.vmem [shape: s32[16,1], index: 1, kind: input, shape index: {}]   ;;  %s696_s2 = inlined_call_operand.hbm [shape: f32[16,128], index: 2, kind: output, shape index: {}]  }
   0x1   :  { %9 = vsyncpa [#allocation3 + $0x1], 0  ;;  %s583_s9 = smov 0   ;;  %s585_s10 = smov 0  }
   0x2   :  { %s587_s11 = smov 0   ;;  %s589_s12 = smov 0  }
   0x3 LB: > { %s604_s13 = sadd.s32 4294967295, %s565_s12   ;;  %s414_s14 = sadd.s32 4294967294, %s565_s12   ;;  %s565_s12 = sphi %s589_s12, %s702_s12   ;;  %s561_s11 = sphi %s587_s11, %s701_s11   ;;  %s557_s10 = sphi %s585_s10, %s700_s10   ;;  %s553_s9 = sphi %s583_s9, %s699_s9  }
   0x4   : > { %s608_s15 = sadd.s32 1, %s565_s12   ;;  %s74_s16 = sadd.s32 1, %s561_s11 }
   0x5   : > { %s71_s17 = ssub.s32 %s565_s12, %s608_s15  ;;  %p84_p0 = scmp.ne.s32.totalorder %s561_s11, %s557_s10 }
   0x6   : > { %p72_p1 = scmp.eq.s32.totalorder %s71_s17, 0  ;;  %p85_p2 = scmp.eq.s32.totalorder %s604_s13, 1 }
   0x7   : > { %p90_p3 = scmp.ne.s32.totalorder %s557_s10, %s553_s9  ;;  %p91_p4 = scmp.eq.s32.totalorder %s414_s14, 1 }
   0x8   : > { %s619_s18 = scalar_select %p72_p1, %s561_s11, %s74_s16  }
   0x9   : > { %p621_p5 = por %p85_p2, %p84_p0  ;;  %p625_p6 = por %p91_p4, %p90_p3 }
   0xa   : > { %p417_p7 = scmp.ge.s32.totalorder %s565_s12, 1  ;;  %p123_p8 = scmp.lt.s32.totalorder %s565_s12, 3 }
   0xc   : > { %p124_p9 = pnand %p417_p7, %p123_p8 }
   0xd   : > { %p148_p10 = scmp.lt.s32.totalorder (!%p124_p9), %s604_s13, 1  ;;  %s145_s29 = sand.u32 (!%p124_p9), 1, %s557_s10  }
   0xe   : > { %127 = sbr.rel (%p124_p9) target bundleno = 628 (0x274), region = 28  ;;  %s418_s30 = sshll.u32 (!%p124_p9), %s145_s29, 3 }
   0xf   : > { %s423_s3 = sshll.u32 (!%p124_p9), %s604_s13, 3  ;;  %s147_s8 = scalar_lea.vmem (!%p124_p9), [#allocation2], %s418_s30 }
  0x10   : > { %s338_s6 = scalar_lea.hbm (!%p124_p9), %s696_s2, %s423_s3  ;;  %s340_s14 = sshll.u32 (!%p124_p9), %s147_s8, 4  ;;  %s341_s14 = int_to_ptr.vmem [resolvable:$true] %s340_s14 }
  0x11   : > { %s342_s16 = sshll.u32 (!%p124_p9), %s338_s6, 4  ;;  %s343_s16 = int_to_ptr.hbm [resolvable:$true] %s342_s16 }
  0x13   : > { %v567_v0 = vmov 0   ;;  %s149_s21 = scalar_select %p148_p10, %s604_s13, 1  ;;  %v172_v7 = vlaneseq  ;;  %vm294_vm1 = vcmask 7168  }
  0x14   : > { %470 = vset.pattern.permute.xlu0 %v567_v0  ;;  %s328_s13 = scalar_lea.sflag [#allocation3], %s145_s29 }
  0x15   : > { %s419_s22 = sshll.u32 %s149_s21, 3  ;;  %v640_v8 = vand.u32 127, %v172_v7  ;;  %s517_s21 = sshra.s32 %s343_s16, 4  ;;  %s518_s21 = int_to_ptr.hbm [resolvable:$true] %s517_s21 }
  0x16   : > { %s151_s25 = scalar_lea.vmem %s694_s0, %s419_s22  ;;  %s155_s28 = scalar_lea.vmem %s695_s1, %s419_s22 }
  0x17   : > { %v156_v1 = vld [vmem:[%s151_s25] sm:$0xff]  ;;  %vm320_vm11 = vcmp.eq.s32.totalorder %v640_v8, 1  ;;  %vm318_vm12 = vcmp.eq.s32.totalorder %v640_v8, 0  ;;  %s519_s22 = scalar_lea.hbm %s518_s21, 8  ;;  %s523_s25 = scalar_lea.hbm %s696_s2, 16 }
  0x18   : > { %158 = vmax.xlane.f32.xlu0 %v156_v1  ;;  %168 = vadd.xlane.f32.xlu2 %v156_v1  ;;  %v157_v2 = vld [vmem:[%s155_s28] sm:$0xff]  ;;  %p520_p11 = scmp.ne.s32.totalorder %s518_s21, %s519_s22  ;;  %p524_p0 = scmp.lt.s32.totalorder %s518_s21, %s696_s2 }
  0x19   : > { %p525_p1 = scmp.lt.s32.totalorder %s523_s25, %s519_s22 }
  0x1a   : > { %p521_p12 = pnand %p520_p11, %p621_p5 }
  0x1b   : > { %p526_p2 = por %p525_p1, %p524_p0 }
  0x1c   : > { %p522_p13 = pneg %p521_p12 }
  0x1e   : > { %p527_p3 = pnand %p526_p2, %p522_p13 }
  0x2c   : > { %175 = vperm.xlu0 %470, %v157_v2  }
  0x8b   : > { %v159_v3 = vpop.xlane.xlu0 %158  ;;  %v169_v16 = vpop.xlane.xlu2 %168 }
  0x8c   : > { %v160_v4 = vsub.f32 %v156_v1, %v159_v3 }
  0x8e   : > { %v161_v5 = vmul.f32 1.442695, %v160_v4 }
  0x90   : > { %471 = vpow2.f32 %v161_v5 }
  0x96   : > { %v472_v6 = vpop.eup %471 }
  0x97   : > { %163 = vadd.xlane.f32.xlu1 %v472_v6 }
  0x9e   : > { %v176_v9 = vpop.permute.xlu0 %175 }
  0x9f   : > { %vm177_vm0 = vcmp.eq.s32.totalorder %v640_v8, %v176_v9 }
  0xa0   : > { %v178_v10 = vsel %vm177_vm0, %v156_v1, 0.0 }
  0xa1   : > { %179 = vadd.xlane.f32.xlu1 %v178_v10 }
 0x10a   : > { %v164_v11 = vpop.xlane.xlu1 %163 }
 0x10b   : > { %473 = vlog2.f32 %v164_v11 }
 0x111   : > { %v474_v12 = vpop.eup %473 }
 0x112   : > { %v166_v13 = vmul.f32 0.6931472, %v474_v12 }
 0x114   : > { %v167_v14 = vadd.f32 %v166_v13, %v159_v3  ;;  %v180_v15 = vpop.xlane.xlu1 %179 }
 0x116   : > { %v181_v17 = vsub.f32 %v167_v14, %v180_v15  ;;  %v170_v18 = vmul.f32 128.0, %v167_v14 }
 0x118   : > { %v643_v19 = vadd.f32 -4.8520303, %v181_v17  ;;  %v171_v20 = vsub.f32 %v170_v18, %v169_v16 }
 0x11a   : > { %v183_v21 = vmul.f32 4.0, %v643_v19  ;;  %v295_v22 = vsel %vm294_vm1, %v171_v20, 0.0 }
 0x11b   : > { %296 = vadd.xlane.f32.xlu2 %v295_v22 }
 0x11c   : > { %v184_v23 = vmax.f32 %v183_v21, -0.7357589 }
 0x11e   : > { %v647_v24 = vmul.f32 0.5, %v184_v23 }
 0x120   : > { %v186_v25 = vmul.f32 2.7182817, %v647_v24  ;;  %v220_v27 = vmax.f32 %v647_v24, 1.2  ;;  %v210_v32 = vmax.f32 %v647_v24, -0.999 }
 0x121   : > { %vm227_vm5 = vcmp.lt.f32.partialorder %v647_v24, 2.0  ;;  %vm226_vm6 = vcmp.lt.f32.partialorder %v647_v24, -0.2 }
 0x122   : > { %v187_v26 = vadd.f32 1.0, %v186_v25  ;;  %475 = vlog2.f32 %v220_v27  ;;  %v211_v36 = vadd.f32 1.0, %v210_v32  ;;  %v214_v42 = vmul.f32 -0.5, %v210_v32 }
 0x123   : > { %v217_v51 = vand.u32 2147483647, %v210_v32 }
 0x124   : > { %v188_v28 = vmul.f32 2.0, %v187_v26  ;;  %v215_v50 = vadd.f32 1.0, %v214_v42 }
 0x125   : > { %vm218_vm4 = vcmp.lt.f32.partialorder %v217_v51, 0.0004427343 }
 0x126   : > { %v189_v29 = vmax.f32 %v188_v28, 0.0  ;;  %v216_v59 = vmul.f32 %v215_v50, %v210_v32 }
 0x128   : > { %477 = vrsqrt.f32 %v189_v29  ;;  %v476_v30 = vpop.eup %475  ;;  %vm197_vm2 = vcmp.eq.f32.partialorder %v189_v29, inf  ;;  %v200_v43 = vand.u32 2147483648, %v189_v29  ;;  %vm199_vm3 = vcmp.eq.f32.partialorder %v189_v29, 0.0 }
 0x129   : > { %v222_v34 = vmul.f32 0.6931472, %v476_v30 }
 0x12b   : > { %479 = vlog2.f32 %v222_v34 }
 0x12c   : > { %481 = vlog2.f32 %v211_v36 }
 0x12e   : > { %v478_v31 = vpop.eup %477 }
 0x12f   : > { %v191_v33 = vmul.f32 %v478_v31, %v189_v29 }
 0x131   : > { %v192_v35 = vmul.f32 %v478_v31, %v191_v33  ;;  %v480_v40 = vpop.eup %479 }
 0x132   : > { %v482_v45 = vpop.eup %481  ;;  %v224_v47 = vmul.f32 0.6931472, %v480_v40 }
 0x133   : > { %v193_v37 = vmul.f32 0.5, %v192_v35  ;;  %v213_v55 = vmul.f32 0.6931472, %v482_v45 }
 0x134   : > { %v225_v56 = vsub.f32 %v222_v34, %v224_v47 }
 0x135   : > { %v194_v38 = vsub.f32 1.5, %v193_v37  ;;  %v219_v61 = vsel %vm218_vm4, %v216_v59, %v213_v55 }
 0x136   : > { %v228_v62 = vsel %vm227_vm5, %v219_v61, %v225_v56 }
 0x137   : > { %v195_v39 = vmul.f32 %v478_v31, %v194_v38 }
 0x139   : > { %v196_v41 = vmul.f32 %v195_v39, %v189_v29 }
 0x13b   : > { %v198_v44 = vsel %vm197_vm2, %v189_v29, %v196_v41 }
 0x13c   : > { %v201_v46 = vsel %vm199_vm3, %v200_v43, %v198_v44 }
 0x13d   : > { %v203_v48 = vmul.f32 %v201_v46, %v201_v46  ;;  %v206_v49 = vmul.f32 0.15277778, %v201_v46  ;;  %v202_v52 = vadd.f32 -1.0, %v201_v46 }
 0x13f   : > { %v204_v53 = vmul.f32 0.33333334, %v203_v48  ;;  %v207_v54 = vmul.f32 %v206_v49, %v201_v46 }
 0x141   : > { %v205_v57 = vsub.f32 %v202_v52, %v204_v53  ;;  %v208_v58 = vmul.f32 %v207_v54, %v201_v46 }
 0x143   : > { %v209_v60 = vadd.f32 %v208_v58, %v205_v57 }
 0x145   : > { %v229_v63 = vsel %vm226_vm6, %v209_v60, %v228_v62 }
 0x146   : > { %v230_v0 = vmul.f32 1.442695, %v229_v63  ;;  %v234_v1 = vadd.f32 1.0, %v229_v63  ;;  %v236_v9 = vadd.f32 2.0, %v229_v63 }
 0x148   : > { %483 = vpow2.f32 %v230_v0  ;;  %v238_v2 = vmul.f32 2.0, %v234_v1 }
 0x14a   : > { %v239_v3 = vadd.f32 1e-20, %v238_v2 }
 0x14c   : > { %485 = vrcp.f32 %v239_v3 }
 0x14e   : > { %v484_v4 = vpop.eup %483 }
 0x14f   : > { %v232_v5 = vmul.f32 %v484_v4, %v229_v63  ;;  %v235_v12 = vmul.f32 %v484_v4, %v234_v1 }
 0x151   : > { %v233_v6 = vsub.f32 %v232_v5, %v647_v24 }
 0x152   : > { %v486_v11 = vpop.eup %485 }
 0x153   : > { %v237_v10 = vmul.f32 %v236_v9, %v233_v6 }
 0x155   : > { %v241_v13 = vmul.f32 %v486_v11, %v237_v10 }
 0x157   : > { %v242_v14 = vsub.f32 %v235_v12, %v241_v13 }
 0x159   : > { %v243_v15 = vand.u32 2147483647, %v242_v14 }
 0x15b   : > { %vm244_vm7 = vcmp.lt.f32.partialorder %v243_v15, 1e-20 }
 0x15c   : > { %v245_v16 = vsel %vm244_vm7, 1e-20, %v242_v14 }
 0x15d   : > { %487 = vrcp.f32 %v245_v16 }
 0x163   : > { %v488_v17 = vpop.eup %487 }
 0x164   : > { %v247_v18 = vmul.f32 %v488_v17, %v233_v6  ;;  %v316_v17 = vshrl.u32 %v172_v7, 7 }
 0x166   : > { %v248_v20 = vsub.f32 %v229_v63, %v247_v18  ;;  %vm317_vm10 = vcmp.eq.s32.totalorder %v316_v17, 0 }
 0x167   : > { %vm321_vm13 = vmand %vm317_vm10, %vm320_vm11 }
 0x168   : > { %v249_v21 = vmul.f32 1.442695, %v248_v20  ;;  %v253_v22 = vadd.f32 1.0, %v248_v20  ;;  %v255_v29 = vadd.f32 2.0, %v248_v20  ;;  %vm319_vm14 = vmand %vm317_vm10, %vm318_vm12 }
 0x16a   : > { %489 = vpow2.f32 %v249_v21  ;;  %v257_v23 = vmul.f32 2.0, %v253_v22 }
 0x16c   : > { %v258_v25 = vadd.f32 1e-20, %v257_v23 }
 0x16e   : > { %491 = vrcp.f32 %v258_v25 }
 0x170   : > { %v490_v26 = vpop.eup %489 }
 0x171   : > { %v251_v27 = vmul.f32 %v490_v26, %v248_v20  ;;  %v254_v32 = vmul.f32 %v490_v26, %v253_v22 }
 0x173   : > { %v252_v28 = vsub.f32 %v251_v27, %v647_v24 }
 0x174   : > { %v492_v31 = vpop.eup %491 }
 0x175   : > { %v256_v30 = vmul.f32 %v255_v29, %v252_v28 }
 0x177   : > { %v260_v33 = vmul.f32 %v492_v31, %v256_v30 }
 0x179   : > { %v261_v34 = vsub.f32 %v254_v32, %v260_v33 }
 0x17b   : > { %v262_v35 = vand.u32 2147483647, %v261_v34 }
 0x17d   : > { %vm263_vm8 = vcmp.lt.f32.partialorder %v262_v35, 1e-20 }
 0x17e   : > { %v264_v36 = vsel %vm263_vm8, 1e-20, %v261_v34 }
 0x17f   : > { %493 = vrcp.f32 %v264_v36 }
 0x185   : > { %v494_v37 = vpop.eup %493 }
 0x186   : > { %v266_v38 = vmul.f32 %v494_v37, %v252_v28 }
 0x188   : > { %v267_v39 = vsub.f32 %v248_v20, %v266_v38 }
 0x18a   : > { %v268_v40 = vmul.f32 1.442695, %v267_v39  ;;  %v272_v41 = vadd.f32 1.0, %v267_v39  ;;  %v274_v51 = vadd.f32 2.0, %v267_v39 }
 0x18c   : > { %495 = vpow2.f32 %v268_v40  ;;  %v276_v42 = vmul.f32 2.0, %v272_v41 }
 0x18e   : > { %v277_v43 = vadd.f32 1e-20, %v276_v42  ;;  %v297_v44 = vpop.xlane.xlu2 %296 }
 0x18f   : > { %v298_v45 = vrot.slane %v297_v44, 4 }
 0x190   : > { %497 = vrcp.f32 %v277_v43 }
 0x191   : > { %v299_v46 = vadd.f32 %v298_v45, %v297_v44 }
 0x192   : > { %v496_v47 = vpop.eup %495 }
 0x193   : > { %v270_v48 = vmul.f32 %v496_v47, %v267_v39  ;;  %v300_v49 = vrot.slane %v299_v46, 2  ;;  %v273_v56 = vmul.f32 %v496_v47, %v272_v41 }
 0x195   : > { %v271_v50 = vsub.f32 %v270_v48, %v647_v24  ;;  %v301_v52 = vadd.f32 %v300_v49, %v299_v46 }
 0x196   : > { %v498_v55 = vpop.eup %497 }
 0x197   : > { %v275_v53 = vmul.f32 %v274_v51, %v271_v50  ;;  %v302_v54 = vrot.slane %v301_v52, 1 }
 0x199   : > { %v279_v57 = vmul.f32 %v498_v55, %v275_v53  ;;  %v303_v58 = vadd.f32 %v302_v54, %v301_v52 }
 0x19b   : > { %v280_v59 = vsub.f32 %v273_v56, %v279_v57  ;;  %426 = vpush %v303_v58 }
 0x19d   : > { %v281_v60 = vand.u32 2147483647, %v280_v59 }
 0x19f   : > { %vm282_vm9 = vcmp.lt.f32.partialorder %v281_v60, 1e-20 }
 0x1a0   : > { %v283_v61 = vsel %vm282_vm9, 1e-20, %v280_v59 }
 0x1a1   : > { %499 = vrcp.f32 %v283_v61 }
 0x1a7   : > { %v500_v62 = vpop.eup %499 }
 0x1a8   : > { %v285_v63 = vmul.f32 %v500_v62, %v271_v50 }
 0x1aa   : > { %v286_v0 = vsub.f32 %v267_v39, %v285_v63 }
 0x1ac   : > { %v287_v1 = vsub.f32 0.0, %v286_v0  ;;  %v291_v24 = vmul.f32 0.25, %v286_v0 }
 0x1ae   : > { %v288_v2 = vmul.f32 1.442695, %v287_v1  ;;  %v292_v5 = vmul.f32 %v291_v24, %v286_v0 }
 0x1b0   : > { %501 = vpow2.f32 %v288_v2 }
 0x1b6   : > { %v502_v3 = vpop.eup %501 }
 0x1b7   : > { %v290_v4 = vmul.f32 %v502_v3, %v643_v19 }
 0x1b9   : > { %v293_v6 = vadd.f32 %v292_v5, %v290_v4 }
 0x1bb   : > { %v305_v9 = vsel %vm294_vm1, %v293_v6, 0.0 }
 0x1bc   : > { %306 = vadd.xlane.f32.xlu1 %v305_v9 }
 0x1cc   : > { %s427_s7 = spop %426 }
 0x1cd   : > { %v324_v19 = vstv %s427_s7 }
 0x22f   : > { %v307_v10 = vpop.xlane.xlu1 %306 }
 0x230   : > { %v308_v11 = vrot.slane %v307_v10, 4 }
 0x232   : > { %v309_v12 = vadd.f32 %v308_v11, %v307_v10 }
 0x234   : > { %v310_v13 = vrot.slane %v309_v12, 2 }
 0x236   : > { %v311_v14 = vadd.f32 %v310_v13, %v309_v12 }
 0x238   : > { %v312_v15 = vrot.slane %v311_v14, 1 }
 0x23a   : > { %v313_v16 = vadd.f32 %v312_v15, %v311_v14 }
 0x23c   : > { %428 = vpush %v313_v16 }
 0x26d   : > { %s429_s17 = spop %428 }
 0x26e   : > { %v322_v7 = vstv %s429_s17 }
 0x26f   : > { %v323_v18 = vsel %vm321_vm13, %v322_v7, 0.0 }
 0x270   : > { %v325_v20 = vsel %vm319_vm14, %v324_v19, %v323_v18 }
 0x271   : > { %326 = vst [vmem:[%s147_s8] sm:$0xff] %v325_v20 }
 0x272   : > { %530 = shalt.err (!%p527_p3)
}
 0x273   : > { %430 = dma.vmem_to_hbm [thread:$0]  (%p621_p5), %s341_s14, 128, %s343_s16, %s328_s13  }
 0x274 PF: > { %p436_p4 = scmp.ge.s32.totalorder %s565_s12, 2  ;;  %s354_s28 = sand.u32 1, %s553_s9  }
 0x275   : > { %s355_s29 = scalar_lea.sflag [#allocation3], %s354_s28 }
 0x276   : > { %p433_p7 = pnand %p436_p4, %p625_p6 }
 0x278   : > { %p434_p8 = pneg %p433_p7 }
 0x27a   : > { %548 = dma.done.wait (%p434_p8), %s355_s29, 128  }
 0x27b   : > { %550 = vsyncadd (%p434_p8), %s355_s29, 4294967168  ;;  %p12_p9 = scmp.ge.s32.totalorder %s608_s15, 4   ;;  %s699_s9 = smov %s557_s10 }
 0x27c   : > { %s700_s10 = smov %s561_s11  ;;  %s701_s11 = smov %s619_s18 }
 0x27d   : > { %s702_s12 = smov %s608_s15  ;;  %14 = sbr.rel (!%p12_p9) target bundleno = 3 (0x3), region = 66 }
 0x282   :  { %361 = vsyncpa [#allocation3], 1 }
 0x283   :  { %363 = vsyncpa [#allocation3 + $0x1], 1 }

</bundles_post_ra>
